<compile_context>
chip_gen: v5e
topology: v5e:2x2
jax: 0.10.0
libtpu: 0.0.40
codegen_flags: <defaults>
</compile_context>

<pallas_src>
import jax
import jax.numpy as jnp
from jax.experimental import pallas as pl
from jax.experimental.pallas import tpu as pltpu

LANE = 128       # TPU lane width (last vreg dim)
SUBLANE = 8      # f32 sublane width


def _round_up(x, m):
    return (x + m - 1) // m * m


def mlp_kernel(x_ref, w1_ref, b1_ref, w23_ref, b23_ref, o_ref):
    """One batch tile: out = relu(x @ W1 + b1) @ W23 + b23 (fc2*fc3 pre-fused)."""
    # In-kernel cast (VPU op, hidden under the memory-bound roofline): avoids a
    # separate wrapper-side convert pass over x when weights are bf16.
    x = x_ref[...].astype(w1_ref.dtype)
    h1 = jnp.dot(x, w1_ref[...], preferred_element_type=jnp.float32)
    h1 = jnp.maximum(h1 + b1_ref[...], 0.0)
    out = jnp.dot(h1.astype(w23_ref.dtype), w23_ref[...],
                  preferred_element_type=jnp.float32)
    o_ref[...] = (out + b23_ref[...]).astype(o_ref.dtype)


def fuse_and_pad_params(params, compute_dtype=None):
    """Fuse fc2*fc3 and pad only the hidden dim to the 128-lane width (once).

    Returns:
      w1p  [num_inputs, 128]   b1p [1, 128]
      w23p [128, num_outputs]  b23 [1, num_outputs]
    Zero padding is exact (relu(0)=0, zero rows contribute nothing).  The
    output feature dim is intentionally NOT padded: writing 8x-padded columns
    would dominate HBM traffic for small num_outputs.
    """
    w1, b1 = params["w1"], params["b1"]
    w2, b2 = params["w2"], params["b2"]
    w3, b3 = params["w3"], params["b3"]
    num_inputs, hidden = w1.shape
    num_outputs = w3.shape[1]

    # NOTE: changes rounding order vs. running fc2/fc3 separately (exact in
    # real arithmetic; negligible in f32, slightly larger error in bf16).
    w23 = w2 @ w3              # [hidden, num_outputs]
    b23 = b2 @ w3 + b3         # [1, num_outputs]

    hp = _round_up(hidden, LANE)
    w1p = jnp.zeros((num_inputs, hp), jnp.float32).at[:, :hidden].set(w1)
    b1p = jnp.zeros((1, hp), jnp.float32).at[:, :hidden].set(b1)
    w23p = jnp.zeros((hp, num_outputs), jnp.float32).at[:hidden, :].set(w23)
    b23p = b23.astype(jnp.float32)

    if compute_dtype is not None:
        # bf16 weights feed the fast MXU path; biases stay f32 (VPU epilogue).
        w1p = w1p.astype(compute_dtype)
        w23p = w23p.astype(compute_dtype)

    return dict(w1p=w1p, b1p=b1p, w23p=w23p, b23p=b23p,
                num_outputs=num_outputs)


def net_forward(x, prepared, *, tb=2048):
    """x: [B, num_inputs] float32 (left in its HBM dtype; cast happens in-kernel)."""
    w1p, b1p = prepared["w1p"], prepared["b1p"]
    w23p, b23p = prepared["w23p"], prepared["b23p"]
    num_outputs = prepared["num_outputs"]

    B, num_inputs = x.shape
    hp = w1p.shape[1]

    # Batch tile:
    #  * big by default (2048) to amortize the ~0.35us per-grid-step overhead,
    #  * never larger than the (sublane-rounded) batch,
    #  * capped so large-enough batches get >= 2 grid steps, so the "parallel"
    #    batch axis can feed both v7x TensorCores (no-op on v5e/v6e).
    tb = min(tb, _round_up(B, SUBLANE))
    if B >= 2 * SUBLANE:
        tb = min(tb, _round_up(pl.cdiv(B, 2), SUBLANE))
    tb = max(tb, SUBLANE)
    grid = (pl.cdiv(B, tb),)

    # Advisory cost hint so XLA schedules neighbor ops around the call.
    itemsize = jnp.dtype(x.dtype).itemsize
    flops = 2 * B * (num_inputs * hp + hp * num_outputs)
    bytes_accessed = (B * num_inputs * itemsize            # x read
                      + B * num_outputs * 4                # out write
                      + w1p.size * jnp.dtype(w1p.dtype).itemsize
                      + w23p.size * jnp.dtype(w23p.dtype).itemsize
                      + b1p.size * 4 + b23p.size * 4)

    out = pl.pallas_call(
        mlp_kernel,
        out_shape=jax.ShapeDtypeStruct((B, num_outputs), jnp.float32),
        grid=grid,
        in_specs=[
            # x tile marches along the batch; the ragged last block's OOB rows
            # only produce output rows that are masked and never stored.
            pl.BlockSpec((tb, num_inputs), lambda i: (i, 0)),
            # Weights / biases: constant block index -> DMA'd once, then kept
            # VMEM-resident across all grid steps (pipeline skips re-fetch).
            pl.BlockSpec((num_inputs, hp), lambda i: (0, 0)),
            pl.BlockSpec((1, hp), lambda i: (0, 0)),
            pl.BlockSpec((hp, num_outputs), lambda i: (0, 0)),
            pl.BlockSpec((1, num_outputs), lambda i: (0, 0)),
        ],
        # Output last dim == full array dim (num_outputs): no column padding,
        # no wrapper-side crop; accepts masked vst in exchange for ~8x fewer
        # HBM write bytes at small num_outputs.
        out_specs=pl.BlockSpec((tb, num_outputs), lambda i: (i, 0)),
        compiler_params=pltpu.CompilerParams(
            dimension_semantics=("parallel",),
        ),
        cost_estimate=pl.CostEstimate(
            flops=flops, transcendentals=0, bytes_accessed=bytes_accessed),
    )(x, w1p, b1p, w23p, b23p)
    return out


def init_params(key, num_inputs, num_outputs):
    """Deterministic init mirroring torch.nn.Linear's uniform(-1/sqrt(fan_in))."""
    dims = [(num_inputs, 64), (64, 32), (32, num_outputs)]
    params = {}
    for i, (fan_in, fan_out) in enumerate(dims, start=1):
        key, kw, kb = jax.random.split(key, 3)
        bound = 1.0 / jnp.sqrt(float(fan_in))
        params[f"w{i}"] = jax.random.uniform(
            kw, (fan_in, fan_out), jnp.float32, -bound, bound)
        params[f"b{i}"] = jax.random.uniform(
            kb, (1, fan_out), jnp.float32, -bound, bound)
    return params


if __name__ == "__main__":
    key = jax.random.PRNGKey(0)
    batch, num_inputs, num_outputs = 8, 32, 16

    key, kx = jax.random.split(key)
    x = jax.random.normal(kx, (batch, num_inputs), jnp.float32)
    params = init_params(key, num_inputs, num_outputs)

    def reference(xx):
        h = jnp.maximum(xx @ params["w1"] + params["b1"], 0.0)
        h = h @ params["w2"] + params["b2"]
        return h @ params["w3"] + params["b3"]

    # --- f32 path, tiny batch (single grid step) ---
    prep_f32 = fuse_and_pad_params(params)
    out = net_forward(x, prep_f32)
    jax.block_until_ready(out)
    ref = reference(x)
    assert out.shape == (batch, num_outputs)
    assert jnp.allclose(out, ref, atol=1e-4, rtol=1e-4)

    # --- exercise the batch grid with a ragged last block (no pad/crop ops) ---
    key, kx2 = jax.random.split(key)
    x2 = jax.random.normal(kx2, (40, num_inputs), jnp.float32)
    out2 = net_forward(x2, prep_f32, tb=16)   # grid=(3,), last block is ragged
    jax.block_until_ready(out2)
    ref2 = reference(x2)
    assert out2.shape == (40, num_outputs)
    assert jnp.allclose(out2, ref2, atol=1e-4, rtol=1e-4)

    # --- bf16 MXU path: weights bf16, x cast inside the kernel ---
    prep_bf16 = fuse_and_pad_params(params, compute_dtype=jnp.bfloat16)
    out3 = net_forward(x, prep_bf16)
    jax.block_until_ready(out3)
    assert out3.shape == (batch, num_outputs)
    assert jnp.allclose(out3, ref, atol=1e-1, rtol=1e-1)

    print("KERNEL_OK")
</pallas_src>

<mosaic_0001>
module attributes {stable_mosaic.version = 11 : i64} {
  func.func @mlp_kernel(%arg0: i32, %arg1: memref<8x32xf32, #tpu.memory_space<vmem>>, %arg2: memref<32x128xf32, #tpu.memory_space<vmem>>, %arg3: memref<1x128xf32, #tpu.memory_space<vmem>>, %arg4: memref<128x16xf32, #tpu.memory_space<vmem>>, %arg5: memref<1x16xf32, #tpu.memory_space<vmem>>, %arg6: memref<8x16xf32, #tpu.memory_space<vmem>>) attributes {dimension_semantics = [#tpu.dimension_semantics<parallel>], iteration_bounds = array<i64: 1>, scalar_prefetch = 0 : i64, scratch_operands = 0 : i64, tpu.core_type = #tpu.core_type<tc>, window_params = [{transform_indices = @transform_0, window_bounds = array<i64: 8, 32>}, {pipeline_mode = #tpu.pipeline_mode<synchronous>, transform_indices = @transform_1, window_bounds = array<i64: 32, 128>}, {pipeline_mode = #tpu.pipeline_mode<synchronous>, transform_indices = @transform_2, window_bounds = array<i64: 1, 128>}, {pipeline_mode = #tpu.pipeline_mode<synchronous>, transform_indices = @transform_3, window_bounds = array<i64: 128, 16>}, {pipeline_mode = #tpu.pipeline_mode<synchronous>, transform_indices = @transform_4, window_bounds = array<i64: 1, 16>}, {transform_indices = @transform_5, window_bounds = array<i64: 8, 16>}]} {
    %c0 = arith.constant 0 : index
    %c0_0 = arith.constant 0 : index
    %0 = vector.load %arg1[%c0, %c0_0] : memref<8x32xf32, #tpu.memory_space<vmem>>, vector<8x32xf32>
    %c0_1 = arith.constant 0 : index
    %c0_2 = arith.constant 0 : index
    %1 = vector.load %arg2[%c0_1, %c0_2] : memref<32x128xf32, #tpu.memory_space<vmem>>, vector<32x128xf32>
    %cst = arith.constant dense<0.000000e+00> : vector<8x128xf32>
    %2 = tpu.matmul %0, %1, %cst {dimension_numbers = #tpu.dot_dimension_numbers<[1], [0], [0], [1], [0, 0, 1, 1], [], []>} : vector<8x32xf32>, vector<32x128xf32>, vector<8x128xf32> -> vector<8x128xf32>
    %c0_3 = arith.constant 0 : index
    %c0_4 = arith.constant 0 : index
    %3 = vector.load %arg3[%c0_3, %c0_4] : memref<1x128xf32, #tpu.memory_space<vmem>>, vector<1x128xf32>
    %4 = vector.broadcast %3 : vector<1x128xf32> to vector<8x128xf32>
    %5 = arith.addf %2, %4 : vector<8x128xf32>
    %cst_5 = arith.constant 0.000000e+00 : f32
    %6 = vector.broadcast %cst_5 : f32 to vector<8x128xf32>
    %7 = arith.maximumf %5, %6 : vector<8x128xf32>
    %c0_6 = arith.constant 0 : index
    %c0_7 = arith.constant 0 : index
    %8 = vector.load %arg4[%c0_6, %c0_7] : memref<128x16xf32, #tpu.memory_space<vmem>>, vector<128x16xf32>
    %cst_8 = arith.constant dense<0.000000e+00> : vector<8x16xf32>
    %9 = tpu.matmul %7, %8, %cst_8 {dimension_numbers = #tpu.dot_dimension_numbers<[1], [0], [0], [1], [0, 0, 1, 1], [], []>} : vector<8x128xf32>, vector<128x16xf32>, vector<8x16xf32> -> vector<8x16xf32>
    %c0_9 = arith.constant 0 : index
    %c0_10 = arith.constant 0 : index
    %10 = vector.load %arg5[%c0_9, %c0_10] : memref<1x16xf32, #tpu.memory_space<vmem>>, vector<1x16xf32>
    %11 = vector.broadcast %10 : vector<1x16xf32> to vector<8x16xf32>
    %12 = arith.addf %9, %11 : vector<8x16xf32>
    %c0_11 = arith.constant 0 : index
    %c0_12 = arith.constant 0 : index
    %13 = vector.load %arg6[%c0_11, %c0_12] : memref<8x16xf32, #tpu.memory_space<vmem>>, vector<8x16xf32>
    tpu.vector_store %arg6[%c0_11, %c0_12], %12 {strides = array<i32>} : memref<8x16xf32, #tpu.memory_space<vmem>>, vector<8x16xf32>,
    return
  }
  func.func @transform_0(%arg0: i32) -> (i32, i32) {
    %c0_i32 = arith.constant 0 : i32
    %c0_i32_0 = arith.constant 0 : i32
    return %arg0, %c0_i32 : i32, i32
  }
  func.func @transform_1(%arg0: i32) -> (i32, i32) {
    %c0_i32 = arith.constant 0 : i32
    %c0_i32_0 = arith.constant 0 : i32
    %c0_i32_1 = arith.constant 0 : i32
    return %c0_i32, %c0_i32_0 : i32, i32
  }
  func.func @transform_2(%arg0: i32) -> (i32, i32) {
    %c0_i32 = arith.constant 0 : i32
    %c0_i32_0 = arith.constant 0 : i32
    %c0_i32_1 = arith.constant 0 : i32
    return %c0_i32, %c0_i32_0 : i32, i32
  }
  func.func @transform_3(%arg0: i32) -> (i32, i32) {
    %c0_i32 = arith.constant 0 : i32
    %c0_i32_0 = arith.constant 0 : i32
    %c0_i32_1 = arith.constant 0 : i32
    return %c0_i32, %c0_i32_0 : i32, i32
  }
  func.func @transform_4(%arg0: i32) -> (i32, i32) {
    %c0_i32 = arith.constant 0 : i32
    %c0_i32_0 = arith.constant 0 : i32
    %c0_i32_1 = arith.constant 0 : i32
    return %c0_i32, %c0_i32_0 : i32, i32
  }
  func.func @transform_5(%arg0: i32) -> (i32, i32) {
    %c0_i32 = arith.constant 0 : i32
    %c0_i32_0 = arith.constant 0 : i32
    return %arg0, %c0_i32 : i32, i32
  }
}

</mosaic_0001>

<bundles_post_ra>
// kernel: tpu_custom_call.1
= control target key start
LH: loop header
LB: loop body
LE: loop exit
PB: predicated region body
PF: predicated region fallthrough
CT: control target
= control target key end

     0   :  { %vm30_vm0 = vcmask 261120   ;;  %s246_s0 = inlined_call_operand.vmem [shape: f32[8,32], index: 0, kind: input, shape index: {}]   ;;  %s247_s1 = inlined_call_operand.vmem [shape: f32[32,128], index: 1, kind: input, shape index: {}]   ;;  %s248_s2 = inlined_call_operand.vmem [shape: f32[1,128], index: 2, kind: input, shape index: {}]   ;;  %s249_s3 = inlined_call_operand.vmem [shape: f32[128,16], index: 3, kind: input, shape index: {}]   ;;  %s250_s4 = inlined_call_operand.vmem [shape: f32[1,16], index: 4, kind: input, shape index: {}]   ;;  %s251_s5 = inlined_call_operand.hbm [shape: f32[8,16], index: 5, kind: output, shape index: {}]  }
   0x1   :  { %v25_v0 = vld [vmem:[%s247_s1 + $0x18] sm:$0xff]  ;;  %v24_v1 = vld [vmem:[%s247_s1 + $0x10] sm:$0xff]  ;;  %v23_v3 = vld [vmem:[%s247_s1 + $0x8] sm:$0xff] }
   0x2   :  { %46 = vmatpush.msra.mxu0 %v25_v0  ;;  %v70_v2 = vld [vmem:[%s249_s3 + $0x78] sm:$0xff]  ;;  %v69_v4 = vld [vmem:[%s249_s3 + $0x70] sm:$0xff]  ;;  %v68_v5 = vld [vmem:[%s249_s3 + $0x68] sm:$0xff] }
   0x3   :  { %75 = vmatpush.msra.mxu1 %v70_v2  ;;  %v22_v6 = vld [vmem:[%s247_s1] sm:$0xff]  ;;  %v66_v9 = vld [vmem:[%s249_s3 + $0x58] sm:$0xff] }
   0x4   :  { %47 = vmatpush.msra.mxu0 %v24_v1  ;;  %v21_v7 = vld [vmem:[%s246_s0] sm:$0xff] }
   0x5   :  { %76 = vmatpush.msra.mxu1 %v69_v4  ;;  %v67_v8 = vld [vmem:[%s249_s3 + $0x60] sm:$0xff] }
   0x6   :  { %48 = vmatpush.msra.mxu0 %v23_v3 }
   0x7   :  { %77 = vmatpush.msra.mxu1 %v68_v5 }
   0x8   :  { %49 = vmatpush.msra.mxu0 %v22_v6 }
   0x9   :  { %10 = vsyncpa [#allocation3], 0  ;;  %113 = vmatmul.msk.f32.vlgmr.msra.gmra.mxu0 %vm30_vm0, %v21_v7  ;;  %78 = vmatpush.msra.mxu1 %v67_v8  ;;  %v65_v10 = vld [vmem:[%s249_s3 + $0x50] sm:$0xff]  ;;  %v64_v11 = vld [vmem:[%s249_s3 + $0x48] sm:$0xff]  ;;  %s143_s12 = smov [#allocation2]   ;;  %s104_s14 = sshll.u32 %s251_s5, 4  ;;  %s105_s14 = int_to_ptr.hbm [resolvable:$true] %s104_s14 }
   0xa   :  { %v63_v12 = vld [vmem:[%s249_s3 + $0x40] sm:$0xff]  ;;  %v62_v13 = vld [vmem:[%s249_s3 + $0x38] sm:$0xff]  ;;  %v61_v14 = vld [vmem:[%s249_s3 + $0x30] sm:$0xff]  ;;  %s102_s1 = sshll.u32 %s143_s12, 4  ;;  %vm95_vm1 = vcmask 130048   ;;  %s103_s1 = int_to_ptr.vmem [resolvable:$true] %s102_s1 }
   0xb   :  { %79 = vmatpush.msra.mxu1 %v66_v9  ;;  %v60_v15 = vld [vmem:[%s249_s3 + $0x28] sm:$0xff]  ;;  %v59_v16 = vld [vmem:[%s249_s3 + $0x20] sm:$0xff]  ;;  %v58_v17 = vld [vmem:[%s249_s3 + $0x18] sm:$0xff] }
   0xc   :  { %v57_v18 = vld [vmem:[%s249_s3 + $0x10] sm:$0xff]  ;;  %v56_v19 = vld [vmem:[%s249_s3 + $0x8] sm:$0xff]  ;;  %v55_v20 = vld [vmem:[%s249_s3] sm:$0xff] }
   0xd   :  { %80 = vmatpush.msra.mxu1 %v65_v10  ;;  %v115_v21 = vld [vmem:[%s248_s2] ss:$0 sm:$0xff] }
   0xe   :  { %v116_v25 = vld [vmem:[%s250_s4] ss:$0 sm:$0xff] }
   0xf   :  { %81 = vmatpush.msra.mxu1 %v64_v11 }
  0x11   :  { %82 = vmatpush.msra.mxu1 %v63_v12 }
  0x13   :  { %83 = vmatpush.msra.mxu1 %v62_v13 }
  0x15   :  { %84 = vmatpush.msra.mxu1 %v61_v14 }
  0x17   :  { %85 = vmatpush.msra.mxu1 %v60_v15 }
  0x19   :  { %86 = vmatpush.msra.mxu1 %v59_v16 }
  0x1b   :  { %87 = vmatpush.msra.mxu1 %v58_v17 }
  0x1d   :  { %88 = vmatpush.msra.mxu1 %v57_v18 }
  0x1f   :  { %89 = vmatpush.msra.mxu1 %v56_v19 }
  0x21   :  { %90 = vmatpush.msra.mxu1 %v55_v20 }
  0x86   :  { %v51_v22 = vpop.f32.mrf.mxu0 }
  0x87   :  { %v52_v23 = vadd.f32 %v115_v21, %v51_v22 }
  0x89   :  { %v54_v24 = vmax.f32 %v52_v23, 0.0 }
  0x8b   :  { %91 = vmatmul.f32.vlgmr.msra.gmra.mxu1 %v54_v24 }
 0x108   :  { %v92_v26 = vpop.f32.mrf.mxu1 }
 0x109   :  { %v93_v27 = vadd.f32 %v116_v25, %v92_v26 }
 0x10b   :  { %96 = vst.msk [vmem:[#allocation2] sm:$0xff] %vm95_vm1, %v93_v27 }
 0x10c   :  { %107 = dma.vmem_to_hbm [thread:$0]  %s103_s1, 128, %s105_s14, [#allocation3]  }
 0x10d   :  { %141 = dma.done.wait [#allocation3], 128  }
 0x10e   :  { %142 = vsyncadd [#allocation3], 4294967168 }
 0x10f   :  { %112 = vsyncpa [#allocation3], 1 }

</bundles_post_ra>
